<compile_context>
chip_gen: v6e
topology: v6e:2x2x1
jax: 0.10.0
libtpu: 0.0.40
codegen_flags: <defaults>
</compile_context>

<pallas_src>
import functools

import jax
import jax.numpy as jnp
import numpy as np
from jax.experimental import pallas as pl
from jax.experimental.pallas import tpu as pltpu


def _round_up(x, m):
    return ((x + m - 1) // m) * m


def center_loss_kernel(xs_ref, ys_ref, center_ref, cnorm2_ref, out_ref, acc_ref,
                       *, block_c, matmul_dtype):
    i = pl.program_id(0)          # batch-block index  (outer)
    j = pl.program_id(1)          # class-block index  (inner / fastest)
    ni = pl.num_programs(0)
    nj = pl.num_programs(1)

    # ---- zero the per-class accumulators on the very first grid step ----
    @pl.when(jnp.logical_and(i == 0, j == 0))
    def _():
        acc_ref[...] = jnp.zeros_like(acc_ref)

    xs = xs_ref[...]              # (TN, F)  f32
    ys = ys_ref[...]              # (TN, 1)  i32 (batch-padding rows carry -1)
    center = center_ref[...]      # (TC, F)  f32, classes [j*TC, (j+1)*TC)
    cnorm2 = cnorm2_ref[...]      # (1, TC)  f32, precomputed ||c||^2

    tn = xs.shape[0]
    tc = center.shape[0]

    # ---- F.normalize(xs): x * rsqrt(max(||x||^2, eps^2)), eps = 1e-12 (EUP) ----
    # Recomputed per class tile: O(TN*F), ~1/TC of the matmul work -> negligible.
    sumsq = jnp.sum(xs * xs, axis=1, keepdims=True)               # (TN, 1)
    inv_norm = jax.lax.rsqrt(jnp.maximum(sumsq, 1e-24))
    xs_n = xs * inv_norm                                          # (TN, F)
    xnorm2 = sumsq * (inv_norm * inv_norm)                        # (TN, 1), ~1

    # ---- one-hot against this tile's class ids ----
    # Rows whose label is outside this tile (incl. the -1 padding rows) get an
    # all-zero one-hot row and therefore contribute nothing below.
    class_ids = jax.lax.broadcasted_iota(jnp.int32, (tn, tc), 1) + j * block_c
    onehot = (ys == class_ids).astype(jnp.float32)                # (TN, TC)

    # ---- MXU: similarities with this tile's centers (contraction over F) ----
    s = jax.lax.dot_general(
        xs_n.astype(matmul_dtype), center.astype(matmul_dtype),
        (((1,), (1,)), ((), ())),
        preferred_element_type=jnp.float32)                       # (TN, TC)

    # ---- fused masked selection: t = ||c||^2 - 2 x.c ; d^2 = ||x||^2 + t_sel ----
    # (one (TN,TC) VPU pass + one lane reduce instead of two of each)
    t = cnorm2 - 2.0 * s                                          # (TN, TC)
    sel = jnp.sum(onehot * t, axis=1, keepdims=True)              # (TN, 1)
    # NOTE: expansion-based distance cancels when x_n ~ c_y; clamp guards the sqrt.
    dist = jnp.sqrt(jnp.maximum(xnorm2 + sel, 0.0))               # (TN, 1)
    # Rows whose label is not in this class tile get sel == 0 -> bogus dist, but
    # their one-hot row is all-zero so the accumulation below drops them exactly.

    # ---- per-class [dist_sum ; count] with ONE MXU dot (contraction over TN),
    #      replacing two XLU sublane reductions.  Kept in f32 for dist precision
    #      (the (2,TC) output is negligible MXU work vs. the similarity matmul). ----
    two_iota = jax.lax.broadcasted_iota(jnp.int32, (tn, 2), 1)
    stacked = jnp.where(two_iota == 0, dist, 1.0)                 # (TN,2): [dist, 1]
    upd = jax.lax.dot_general(stacked, onehot, (((0,), (0,)), ((), ())),
                              preferred_element_type=jnp.float32)  # (2, TC)

    cur = acc_ref[j]                                              # (2, TC)
    acc_ref[j] = cur + upd

    # ---- finalize once: C divisions + reduce instead of N divisions ----
    @pl.when(jnp.logical_and(i == ni - 1, j == nj - 1))
    def _():
        acc = acc_ref[...]                                        # (nC, 2, TC)
        dist_sum = acc[:, 0, :]                                   # (nC, TC)
        count = acc[:, 1, :]
        # classes absent from ys (incl. class padding) have dist_sum == 0,
        # so max(count, 1) is safe.
        per_class = dist_sum / jnp.maximum(count, 1.0)            # (nC, TC)
        per_blk = jnp.sum(per_class, axis=1, keepdims=True)       # (nC, 1)
        out_ref[...] = jnp.sum(per_blk, axis=0, keepdims=True)    # (1, 1)


def center_loss(xs, ys, center, *, block_n=None, block_c=None,
                matmul_dtype=jnp.float32):
    """CenterLoss forward.

    xs: (N, feature_num) float, ys: (N,) int labels in [0, cls_num),
    center: (cls_num, feature_num) float.

    matmul_dtype=jnp.bfloat16 runs the similarity contraction at bf16 MXU
    throughput; keep the f32 default when distances may sit near zero (the
    ||x||^2 - 2x.c + ||c||^2 expansion amplifies the rounding there).
    """
    xs = xs.astype(jnp.float32)
    center = center.astype(jnp.float32)
    ys = ys.astype(jnp.int32)

    n, feat = xs.shape
    c = center.shape[0]

    # ---- pad feature dim to a lane multiple (zero columns change nothing) ----
    f_pad = _round_up(feat, 128)
    if f_pad != feat:
        xs = jnp.pad(xs, ((0, 0), (0, f_pad - feat)))
        center = jnp.pad(center, ((0, 0), (0, f_pad - feat)))

    # ---- pad / tile the class dim (padded classes: count = 0, dist_sum = 0) ----
    c_pad = _round_up(c, 128)
    if block_c is None:
        block_c = min(c_pad, 512)
    block_c = min(_round_up(block_c, 128), c_pad)
    c_pad = _round_up(c_pad, block_c)
    if c_pad != c:
        center = jnp.pad(center, ((0, c_pad - c), (0, 0)))

    # ---- batch tile: biggest that keeps the (TN, max(F, TC)) slabs ~4 MiB each ----
    if block_n is None:
        slab_w = max(f_pad, block_c)
        budget_rows = max(8, (4 << 20) // (slab_w * 4))
        block_n = min(1024, budget_rows, _round_up(n, 8))
    block_n = max(8, _round_up(block_n, 8))
    n_pad = _round_up(n, block_n)
    if n_pad != n:
        xs = jnp.pad(xs, ((0, n_pad - n), (0, 0)))
        ys = jnp.pad(ys, (0, n_pad - n), constant_values=-1)  # -1 -> matches no class
    ys2 = ys.reshape(n_pad, 1)

    # ||c||^2 precomputed once (folded into the fused t = ||c||^2 - 2 s).
    cnorm2 = jnp.sum(center * center, axis=1)[None, :]            # (1, c_pad)

    num_n = n_pad // block_n
    num_c = c_pad // block_c
    grid = (num_n, num_c)   # class tiles innermost: the xs/ys tiles are not
                            # re-fetched across j; the (small) center tiles cycle.

    # ---- scoped-VMEM budget sized to the actual buffers (+50% headroom),
    #      raised explicitly (v5e default is only 16 MiB), capped for v7x ----
    vmem_bytes = (
        2 * block_n * f_pad * 4            # xs tiles (double-buffered)
        + 2 * block_n * 128 * 4            # ys tiles (lane-padded)
        + 2 * block_c * f_pad * 4          # center tiles (double-buffered)
        + 2 * 8 * block_c * 4              # ||c||^2 tiles
        + num_c * 8 * block_c * 4          # per-class accumulator scratch
        + 6 * block_n * max(block_c, f_pad) * 4   # onehot / s / t / xs_n slabs
    )
    vmem_limit = int(min(64 << 20, max(32 << 20, int(vmem_bytes * 1.5))))

    kernel = functools.partial(center_loss_kernel, block_c=block_c,
                               matmul_dtype=matmul_dtype)

    out = pl.pallas_call(
        kernel,
        out_shape=jax.ShapeDtypeStruct((1, 1), jnp.float32),
        grid_spec=pltpu.PrefetchScalarGridSpec(
            num_scalar_prefetch=0,
            grid=grid,
            in_specs=[
                pl.BlockSpec((block_n, f_pad), lambda i, j: (i, 0)),  # xs tile
                pl.BlockSpec((block_n, 1), lambda i, j: (i, 0)),      # ys tile
                pl.BlockSpec((block_c, f_pad), lambda i, j: (j, 0)),  # center tile
                pl.BlockSpec((1, block_c), lambda i, j: (0, j)),      # ||c||^2 tile
            ],
            out_specs=pl.BlockSpec((1, 1), lambda i, j: (0, 0)),      # scalar loss
            scratch_shapes=[
                pltpu.VMEM((num_c, 2, block_c), jnp.float32),  # [dist_sum ; count]
            ],
        ),
        compiler_params=pltpu.CompilerParams(
            # both axes reduce into resident scratch / the resident scalar output
            dimension_semantics=("arbitrary", "arbitrary"),
            vmem_limit_bytes=vmem_limit,
        ),
    )(xs, ys2, center, cnorm2)
    return out[0, 0]


def center_loss_ref(xs, ys, center):
    """Plain-JAX reference mirroring the PyTorch forward exactly."""
    xs = xs.astype(jnp.float32)
    norm = jnp.sqrt(jnp.sum(xs * xs, axis=1, keepdims=True))
    xs_n = xs / jnp.maximum(norm, 1e-12)
    ys = ys.astype(jnp.int32)
    center_exp = center[ys]
    count = jnp.sum(ys[:, None] == jnp.arange(center.shape[0])[None, :], axis=0)
    count_dis = count[ys].astype(jnp.float32)
    dist = jnp.sqrt(jnp.sum((xs_n - center_exp) ** 2, axis=1))
    return jnp.sum(dist / count_dis)


if __name__ == "__main__":
    key = jax.random.PRNGKey(0)

    # Case 1: single grid step (batch N=8, feature_num=32, cls_num=4).
    N, FEAT, CLS = 8, 32, 4
    k_x, k_y, k_c, key = jax.random.split(key, 4)
    xs = jax.random.normal(k_x, (N, FEAT), dtype=jnp.float32)
    ys = jax.random.randint(k_y, (N,), 0, CLS, dtype=jnp.int32)
    center = jax.random.normal(k_c, (CLS, FEAT), dtype=jnp.float32)
    loss = jax.block_until_ready(center_loss(xs, ys, center))
    np.testing.assert_allclose(np.asarray(loss),
                               np.asarray(center_loss_ref(xs, ys, center)),
                               rtol=1e-4, atol=1e-4)

    # Case 2: multiple batch blocks + batch padding (N=19 -> 24, block_n=8).
    N2 = 19
    k_x2, k_y2, k_c2, key = jax.random.split(key, 4)
    xs2 = jax.random.normal(k_x2, (N2, FEAT), dtype=jnp.float32)
    ys2 = jax.random.randint(k_y2, (N2,), 0, CLS, dtype=jnp.int32)
    center2 = jax.random.normal(k_c2, (CLS, FEAT), dtype=jnp.float32)
    loss2 = jax.block_until_ready(center_loss(xs2, ys2, center2, block_n=8))
    np.testing.assert_allclose(np.asarray(loss2),
                               np.asarray(center_loss_ref(xs2, ys2, center2)),
                               rtol=1e-4, atol=1e-4)

    # Case 3: class tiling exercised (cls_num=260 -> 3 class blocks of 128)
    # together with a multi-block batch axis and class/feature padding.
    N3, FEAT3, CLS3 = 40, 96, 260
    k_x3, k_y3, k_c3, key = jax.random.split(key, 4)
    xs3 = jax.random.normal(k_x3, (N3, FEAT3), dtype=jnp.float32)
    ys3 = jax.random.randint(k_y3, (N3,), 0, CLS3, dtype=jnp.int32)
    center3 = jax.random.normal(k_c3, (CLS3, FEAT3), dtype=jnp.float32)
    ref3 = center_loss_ref(xs3, ys3, center3)
    loss3 = jax.block_until_ready(
        center_loss(xs3, ys3, center3, block_n=16, block_c=128))
    np.testing.assert_allclose(np.asarray(loss3), np.asarray(ref3),
                               rtol=5e-4, atol=5e-4)

    # Case 4: same inputs on the bf16-MXU fast path (looser tolerance — the
    # expansion-based distance amplifies bf16 rounding, per the review note).
    loss4 = jax.block_until_ready(
        center_loss(xs3, ys3, center3, block_n=16, block_c=128,
                    matmul_dtype=jnp.bfloat16))
    np.testing.assert_allclose(np.asarray(loss4), np.asarray(ref3),
                               rtol=1e-2, atol=1e-2)

    print("KERNEL_OK")
</pallas_src>

<mosaic_0001>
module attributes {stable_mosaic.version = 11 : i64} {
  func.func @center_loss_kernel(%arg0: i32, %arg1: i32, %arg2: memref<8x128xf32, #tpu.memory_space<vmem>>, %arg3: memref<8x1xi32, #tpu.memory_space<vmem>>, %arg4: memref<128x128xf32, #tpu.memory_space<vmem>>, %arg5: memref<1x128xf32, #tpu.memory_space<vmem>>, %arg6: memref<1x1xf32, #tpu.memory_space<vmem>>, %arg7: memref<1x2x128xf32, #tpu.memory_space<vmem>>) attributes {dimension_semantics = [#tpu.dimension_semantics<arbitrary>, #tpu.dimension_semantics<arbitrary>], iteration_bounds = array<i64: 1, 1>, scalar_prefetch = 0 : i64, scratch_operands = 1 : i64, tpu.core_type = #tpu.core_type<tc>, window_params = [{transform_indices = @transform_0, window_bounds = array<i64: 8, 128>}, {transform_indices = @transform_1, window_bounds = array<i64: 8, 1>}, {transform_indices = @transform_2, window_bounds = array<i64: 128, 128>}, {transform_indices = @transform_3, window_bounds = array<i64: 1, 128>}, {pipeline_mode = #tpu.pipeline_mode<synchronous>, transform_indices = @transform_4, window_bounds = array<i64: 1, 1>}]} {
    %c0_i32 = arith.constant 0 : i32
    %0 = arith.cmpi eq, %arg0, %c0_i32 : i32
    %c0_i32_0 = arith.constant 0 : i32
    %1 = arith.cmpi eq, %arg1, %c0_i32_0 : i32
    %2 = arith.andi %0, %1 : i1
    %3 = arith.extui %2 : i1 to i32
    %c0_i32_1 = arith.constant 0 : i32
    %4 = arith.cmpi ne, %3, %c0_i32_1 : i32
    scf.if %4 {
      %cst_24 = arith.constant 0.000000e+00 : f32
      %60 = vector.broadcast %cst_24 : f32 to vector<1x2x128xf32>
      %c0_25 = arith.constant 0 : index
      %c0_26 = arith.constant 0 : index
      %c0_27 = arith.constant 0 : index
      %61 = vector.load %arg7[%c0_25, %c0_26, %c0_27] : memref<1x2x128xf32, #tpu.memory_space<vmem>>, vector<1x2x128xf32>
      tpu.vector_store %arg7[%c0_25, %c0_26, %c0_27], %60 {strides = array<i32>} : memref<1x2x128xf32, #tpu.memory_space<vmem>>, vector<1x2x128xf32>,
    } else {
    }
    %c0 = arith.constant 0 : index
    %c0_2 = arith.constant 0 : index
    %5 = vector.load %arg2[%c0, %c0_2] : memref<8x128xf32, #tpu.memory_space<vmem>>, vector<8x128xf32>
    %c0_3 = arith.constant 0 : index
    %c0_4 = arith.constant 0 : index
    %6 = vector.load %arg3[%c0_3, %c0_4] : memref<8x1xi32, #tpu.memory_space<vmem>>, vector<8x1xi32>
    %c0_5 = arith.constant 0 : index
    %c0_6 = arith.constant 0 : index
    %7 = vector.load %arg4[%c0_5, %c0_6] : memref<128x128xf32, #tpu.memory_space<vmem>>, vector<128x128xf32>
    %c0_7 = arith.constant 0 : index
    %c0_8 = arith.constant 0 : index
    %8 = vector.load %arg5[%c0_7, %c0_8] : memref<1x128xf32, #tpu.memory_space<vmem>>, vector<1x128xf32>
    %9 = arith.mulf %5, %5 : vector<8x128xf32>
    %cst = arith.constant dense<0.000000e+00> : vector<8xf32>
    %10 = vector.multi_reduction <add>, %9, %cst [1] : vector<8x128xf32> to vector<8xf32>
    %11 = vector.shape_cast %10 : vector<8xf32> to vector<8x1xf32>
    %cst_9 = arith.constant 1.000000e-24 : f32
    %12 = vector.broadcast %cst_9 : f32 to vector<8x1xf32>
    %13 = arith.maximumf %11, %12 : vector<8x1xf32>
    %14 = math.rsqrt %13 : vector<8x1xf32>
    %15 = vector.broadcast %14 : vector<8x1xf32> to vector<8x128xf32>
    %16 = arith.mulf %5, %15 : vector<8x128xf32>
    %17 = arith.mulf %14, %14 : vector<8x1xf32>
    %18 = arith.mulf %11, %17 : vector<8x1xf32>
    %19 = tpu.iota {dimensions = array<i32: 1>} : vector<8x128xi32>
    %c128_i32 = arith.constant 128 : i32
    %20 = arith.muli %arg1, %c128_i32 : i32
    %21 = vector.broadcast %20 : i32 to vector<8x128xi32>
    %22 = arith.addi %19, %21 : vector<8x128xi32>
    %23 = vector.broadcast %6 : vector<8x1xi32> to vector<8x128xi32>
    %24 = arith.cmpi eq, %23, %22 : vector<8x128xi32>
    %25 = arith.extui %24 : vector<8x128xi1> to vector<8x128xi32>
    %26 = arith.sitofp %25 : vector<8x128xi32> to vector<8x128xf32>
    %cst_10 = arith.constant dense<0.000000e+00> : vector<8x128xf32>
    %27 = tpu.matmul %16, %7, %cst_10 {dimension_numbers = #tpu.dot_dimension_numbers<[1], [1], [0], [0], [0, 0, 1, 0], [], []>} : vector<8x128xf32>, vector<128x128xf32>, vector<8x128xf32> -> vector<8x128xf32>
    %cst_11 = arith.constant 2.000000e+00 : f32
    %28 = vector.broadcast %cst_11 : f32 to vector<8x128xf32>
    %29 = arith.mulf %28, %27 : vector<8x128xf32>
    %30 = vector.broadcast %8 : vector<1x128xf32> to vector<8x128xf32>
    %31 = arith.subf %30, %29 : vector<8x128xf32>
    %32 = arith.mulf %26, %31 : vector<8x128xf32>
    %cst_12 = arith.constant dense<0.000000e+00> : vector<8xf32>
    %33 = vector.multi_reduction <add>, %32, %cst_12 [1] : vector<8x128xf32> to vector<8xf32>
    %34 = vector.shape_cast %33 : vector<8xf32> to vector<8x1xf32>
    %35 = arith.addf %18, %34 : vector<8x1xf32>
    %cst_13 = arith.constant 0.000000e+00 : f32
    %36 = vector.broadcast %cst_13 : f32 to vector<8x1xf32>
    %37 = arith.maximumf %35, %36 : vector<8x1xf32>
    %38 = math.sqrt %37 : vector<8x1xf32>
    %39 = tpu.iota {dimensions = array<i32: 1>} : vector<8x2xi32>
    %c0_i32_14 = arith.constant 0 : i32
    %40 = vector.broadcast %c0_i32_14 : i32 to vector<8x2xi32>
    %41 = arith.cmpi eq, %39, %40 : vector<8x2xi32>
    %cst_15 = arith.constant 1.000000e+00 : f32
    %42 = vector.shape_cast %38 : vector<8x1xf32> to vector<8x1xf32>
    %43 = vector.broadcast %42 : vector<8x1xf32> to vector<8x2xf32>
    %44 = vector.broadcast %cst_15 : f32 to vector<8x2xf32>
    %45 = arith.select %41, %43, %44 : vector<8x2xi1>, vector<8x2xf32>
    %cst_16 = arith.constant dense<0.000000e+00> : vector<2x128xf32>
    %46 = tpu.matmul %45, %26, %cst_16 {dimension_numbers = #tpu.dot_dimension_numbers<[0], [0], [1], [1], [0, 1, 1, 1], [], []>} : vector<8x2xf32>, vector<8x128xf32>, vector<2x128xf32> -> vector<2x128xf32>
    %47 = arith.index_cast %arg1 : i32 to index
    %c0_17 = arith.constant 0 : index
    %c0_18 = arith.constant 0 : index
    %48 = vector.load %arg7[%47, %c0_17, %c0_18] : memref<1x2x128xf32, #tpu.memory_space<vmem>>, vector<1x2x128xf32>
    %49 = vector.shape_cast %48 : vector<1x2x128xf32> to vector<2x128xf32>
    %50 = arith.addf %49, %46 : vector<2x128xf32>
    %51 = arith.index_cast %arg1 : i32 to index
    %c0_19 = arith.constant 0 : index
    %c0_20 = arith.constant 0 : index
    %52 = vector.load %arg7[%51, %c0_19, %c0_20] : memref<1x2x128xf32, #tpu.memory_space<vmem>>, vector<1x2x128xf32>
    %53 = vector.shape_cast %52 : vector<1x2x128xf32> to vector<2x128xf32>
    %54 = vector.shape_cast %50 : vector<2x128xf32> to vector<1x2x128xf32>
    tpu.vector_store %arg7[%51, %c0_19, %c0_20], %54 {strides = array<i32>} : memref<1x2x128xf32, #tpu.memory_space<vmem>>, vector<1x2x128xf32>,
    %c0_i32_21 = arith.constant 0 : i32
    %55 = arith.cmpi eq, %arg0, %c0_i32_21 : i32
    %c0_i32_22 = arith.constant 0 : i32
    %56 = arith.cmpi eq, %arg1, %c0_i32_22 : i32
    %57 = arith.andi %55, %56 : i1
    %58 = arith.extui %57 : i1 to i32
    %c0_i32_23 = arith.constant 0 : i32
    %59 = arith.cmpi ne, %58, %c0_i32_23 : i32
    scf.if %59 {
      %c0_24 = arith.constant 0 : index
      %c0_25 = arith.constant 0 : index
      %c0_26 = arith.constant 0 : index
      %60 = vector.load %arg7[%c0_24, %c0_25, %c0_26] : memref<1x2x128xf32, #tpu.memory_space<vmem>>, vector<1x2x128xf32>
      %61 = vector.extract_strided_slice %60 {offsets = [0, 0, 0], sizes = [1, 1, 128], strides = [1, 1, 1]} : vector<1x2x128xf32> to vector<1x1x128xf32>
      %62 = vector.shape_cast %61 : vector<1x1x128xf32> to vector<1x128xf32>
      %63 = vector.extract_strided_slice %60 {offsets = [0, 1, 0], sizes = [1, 1, 128], strides = [1, 1, 1]} : vector<1x2x128xf32> to vector<1x1x128xf32>
      %64 = vector.shape_cast %63 : vector<1x1x128xf32> to vector<1x128xf32>
      %cst_27 = arith.constant 1.000000e+00 : f32
      %65 = vector.broadcast %cst_27 : f32 to vector<1x128xf32>
      %66 = arith.maximumf %64, %65 : vector<1x128xf32>
      %67 = arith.divf %62, %66 : vector<1x128xf32>
      %cst_28 = arith.constant dense<0.000000e+00> : vector<1xf32>
      %68 = vector.multi_reduction <add>, %67, %cst_28 [1] : vector<1x128xf32> to vector<1xf32>
      %69 = vector.shape_cast %68 : vector<1xf32> to vector<1x1xf32>
      %cst_29 = arith.constant dense<0.000000e+00> : vector<1xf32>
      %70 = vector.multi_reduction <add>, %69, %cst_29 [0] : vector<1x1xf32> to vector<1xf32>
      %71 = vector.shape_cast %70 : vector<1xf32> to vector<1x1xf32>
      %c0_30 = arith.constant 0 : index
      %c0_31 = arith.constant 0 : index
      %72 = vector.load %arg6[%c0_30, %c0_31] : memref<1x1xf32, #tpu.memory_space<vmem>>, vector<1x1xf32>
      tpu.vector_store %arg6[%c0_30, %c0_31], %71 {strides = array<i32>} : memref<1x1xf32, #tpu.memory_space<vmem>>, vector<1x1xf32>,
    } else {
    }
    return
  }
  func.func @transform_0(%arg0: i32, %arg1: i32) -> (i32, i32) {
    %c0_i32 = arith.constant 0 : i32
    %c0_i32_0 = arith.constant 0 : i32
    return %arg0, %c0_i32 : i32, i32
  }
  func.func @transform_1(%arg0: i32, %arg1: i32) -> (i32, i32) {
    %c0_i32 = arith.constant 0 : i32
    %c0_i32_0 = arith.constant 0 : i32
    return %arg0, %c0_i32 : i32, i32
  }
  func.func @transform_2(%arg0: i32, %arg1: i32) -> (i32, i32) {
    %c0_i32 = arith.constant 0 : i32
    %c0_i32_0 = arith.constant 0 : i32
    return %arg1, %c0_i32 : i32, i32
  }
  func.func @transform_3(%arg0: i32, %arg1: i32) -> (i32, i32) {
    %c0_i32 = arith.constant 0 : i32
    %c0_i32_0 = arith.constant 0 : i32
    return %c0_i32, %arg1 : i32, i32
  }
  func.func @transform_4(%arg0: i32, %arg1: i32) -> (i32, i32) {
    %c0_i32 = arith.constant 0 : i32
    %c0_i32_0 = arith.constant 0 : i32
    %c0_i32_1 = arith.constant 0 : i32
    return %c0_i32, %c0_i32_0 : i32, i32
  }
}

</mosaic_0001>

<bundles_post_ra>
// kernel: tpu_custom_call.1
= control target key start
LH: loop header
LB: loop body
LE: loop exit
PB: predicated region body
PF: predicated region fallthrough
CT: control target
= control target key end

     0   :  { %9 = vsyncpa [#allocation4], 0  ;;  %s502_s0 = inlined_call_operand.vmem [shape: f32[8,128], index: 0, kind: input, shape index: {}]   ;;  %s503_s1 = inlined_call_operand.vmem [shape: s32[8,1], index: 1, kind: input, shape index: {}]   ;;  %s504_s2 = inlined_call_operand.hbm [shape: f32[128,128], index: 2, kind: input, shape index: {}]   ;;  %s505_s3 = inlined_call_operand.vmem [shape: f32[1,128], index: 3, kind: input, shape index: {}]   ;;  %s506_s4 = inlined_call_operand.hbm [shape: f32[1,1], index: 4, kind: output, shape index: {}]  }
   0x1   :  { %10 = vsyncpa [#allocation5], 0  ;;  %s433_s15 = smov [#allocation3]  }
   0x2   :  { %s20_s16 = sshll.u32 %s433_s15, 4  ;;  %s21_s16 = int_to_ptr.vmem [resolvable:$true] %s20_s16 }
   0x3   :  { %s397_s17 = scalar_lea.vmem %s21_s16, 2048  ;;  %p402_p1 = scmp.lt.s32.totalorder %s21_s16, %s21_s16 }
   0x4   :  { %p398_p0 = scmp.ne.s32.totalorder %s21_s16, %s397_s17  ;;  %p403_p2 = scmp.lt.s32.totalorder %s397_s17, %s397_s17 }
   0x6   :  { %p404_p3 = por %p403_p2, %p402_p1 }
   0x8   :  { %p405_p4 = pnand %p404_p3, %p398_p0 }
   0xa   :  { %408 = shalt.err (!%p405_p4)
}
   0xb   :  { %s434_s18 = smov 128   ;;  %s435_s19 = smov 8  }
   0xc   :  { %26 = dma.hbm_to_vmem [thread:$0]  %s504_s2, 2048, %s21_s16, [#allocation4], %s434_s18, %s434_s18, %s435_s19  }
   0xd   :  { %429 = dma.done.wait [#allocation4], 2048  }
   0xe   :  { %430 = vsyncadd [#allocation4], 4294965248  ;;  %v436_v0 = vmov 0.0   ;;  %v39_v1 = vld [vmem:[%s502_s0] sm:$0xff]  ;;  %v55_v4 = vld [vmem:[#allocation3 + $0x70] sm:$0xff]  ;;  %vm437_vm0 = vmmov 0   ;;  %v66_v25 = vlaneseq }
   0xf   :  { %334 = vmatprep.subr.mxu0 %v436_v0  ;;  %38 = vst [vmem:[#allocation2] sm:$0x3] %v436_v0  ;;  %369 = vmatprep.subr.mxu1 %v436_v0  ;;  %v56_v2 = vld [vmem:[#allocation3 + $0x78] sm:$0xff]  ;;  %v58_v3 = vmul.f32 %v39_v1, %v39_v1  ;;  %v54_v5 = vld [vmem:[#allocation3 + $0x68] sm:$0xff]  ;;  %v53_v6 = vld [vmem:[#allocation3 + $0x60] sm:$0xff]  ;;  %v438_v13 = vmov 0  }
  0x10   :  { %335 = vmatpush3.xpose.msra.mxu0 %v56_v2  ;;  %v52_v7 = vld [vmem:[#allocation3 + $0x58] sm:$0xff]  ;;  %v51_v8 = vld [vmem:[#allocation3 + $0x50] sm:$0xff]  ;;  %v50_v9 = vld [vmem:[#allocation3 + $0x48] sm:$0xff]  ;;  %366 = vmatprep.mubr.msk.f32.mxu0 %vm437_vm0, %v436_v0  ;;  %v67_v26 = vand.u32 127, %v66_v25  ;;  %v439_v28 = vmov 1.0   ;;  %vm201_vm5 = vcmask 64512  }
  0x11   :  { %336 = vmatprep.subr.mxu0 %v436_v0  ;;  %59 = vadd.xlane.f32.xlu0 %v58_v3  ;;  %v49_v10 = vld [vmem:[#allocation3 + $0x40] sm:$0xff]  ;;  %v48_v11 = vld [vmem:[#allocation3 + $0x38] sm:$0xff]  ;;  %v47_v14 = vld [vmem:[#allocation3 + $0x30] sm:$0xff]  ;;  %vm289_vm6 = vcmask 1040384   ;;  %vm294_vm7 = vcmask 0  }
  0x12   :  { %v40_v12 = vld [vmem:[%s503_s1] sm:$0xff]  ;;  %371 = vmatprep.mubr.msk.f32.mxu1 %vm437_vm0, %v436_v0  ;;  %382 = vset.pattern.permute.xlu0 %v438_v13  ;;  %v46_v15 = vld [vmem:[#allocation3 + $0x28] sm:$0xff]  ;;  %v43_v18 = vld [vmem:[#allocation3 + $0x10] sm:$0xff]  ;;  %vm167_vm3 = vcmp.eq.s32.totalorder %v67_v26, 0 }
  0x13   :  { %v45_v16 = vld [vmem:[#allocation3 + $0x20] sm:$0xff]  ;;  %v44_v17 = vld [vmem:[#allocation3 + $0x18] sm:$0xff]  ;;  %v42_v19 = vld [vmem:[#allocation3 + $0x8] sm:$0xff] }
  0x14   :  { %337 = vmatpush3.xpose.msra.mxu0 %v55_v4  ;;  %v41_v20 = vld [vmem:[#allocation3] sm:$0xff]  ;;  %v312_v30 = vld [vmem:[%s505_s3] ss:$0 sm:$0xff]  ;;  %s440_s3 = smov [#allocation6]  }
  0x15   :  { %338 = vmatprep.subr.mxu0 %v436_v0  ;;  %s302_s25 = sshll.u32 %s440_s3, 4  ;;  %s303_s25 = int_to_ptr.vmem [resolvable:$true] %s302_s25 }
  0x16   :  { %v277_v48 = vld [vmem:[#allocation2] sm:$0x3]  ;;  %s409_s26 = scalar_lea.vmem %s303_s25, 16  ;;  %s413_s27 = scalar_lea.vmem %s303_s25, 32 }
  0x17   :  { %p410_p5 = scmp.ne.s32.totalorder %s303_s25, %s409_s26  ;;  %p414_p6 = scmp.lt.s32.totalorder %s303_s25, %s303_s25 }
  0x18   :  { %339 = vmatpush3.xpose.msra.mxu0 %v54_v5  ;;  %p415_p7 = scmp.lt.s32.totalorder %s413_s27, %s409_s26 }
  0x19   :  { %340 = vmatprep.subr.mxu0 %v436_v0 }
  0x1a   :  { %p416_p8 = por %p415_p7, %p414_p6 }
  0x1c   :  { %341 = vmatpush3.xpose.msra.mxu0 %v53_v6  ;;  %p417_p9 = pnand %p416_p8, %p410_p5 }
  0x1d   :  { %342 = vmatprep.subr.mxu0 %v436_v0 }
  0x20   :  { %343 = vmatpush3.xpose.msra.mxu0 %v52_v7 }
  0x21   :  { %344 = vmatprep.subr.mxu0 %v436_v0 }
  0x24   :  { %345 = vmatpush3.xpose.msra.mxu0 %v51_v8 }
  0x25   :  { %346 = vmatprep.subr.mxu0 %v436_v0 }
  0x27   :  { %72 = vperm.xlu0 %382, %v40_v12  }
  0x28   :  { %347 = vmatpush3.xpose.msra.mxu0 %v50_v9 }
  0x29   :  { %348 = vmatprep.subr.mxu0 %v436_v0 }
  0x2c   :  { %349 = vmatpush3.xpose.msra.mxu0 %v49_v10 }
  0x2d   :  { %350 = vmatprep.subr.mxu0 %v436_v0 }
  0x30   :  { %351 = vmatpush3.xpose.msra.mxu0 %v48_v11 }
  0x31   :  { %352 = vmatprep.subr.mxu0 %v436_v0 }
  0x34   :  { %353 = vmatpush3.xpose.msra.mxu0 %v47_v14 }
  0x35   :  { %354 = vmatprep.subr.mxu0 %v436_v0 }
  0x38   :  { %355 = vmatpush3.xpose.msra.mxu0 %v46_v15 }
  0x39   :  { %356 = vmatprep.subr.mxu0 %v436_v0 }
  0x3c   :  { %357 = vmatpush3.xpose.msra.mxu0 %v45_v16 }
  0x3d   :  { %358 = vmatprep.subr.mxu0 %v436_v0 }
  0x40   :  { %359 = vmatpush3.xpose.msra.mxu0 %v44_v17 }
  0x41   :  { %360 = vmatprep.subr.mxu0 %v436_v0 }
  0x44   :  { %361 = vmatpush3.xpose.msra.mxu0 %v43_v18 }
  0x45   :  { %362 = vmatprep.subr.mxu0 %v436_v0 }
  0x48   :  { %363 = vmatpush3.xpose.msra.mxu0 %v42_v19 }
  0x49   :  { %364 = vmatprep.subr.mxu0 %v436_v0 }
  0x4c   :  { %365 = vmatpush3.xpose.msra.mxu0 %v41_v20 }
  0x9a   :  { %v60_v21 = vpop.xlane.xlu0 %59 }
  0x9b   :  { %v61_v22 = vmax.f32 %v60_v21, 1e-24 }
  0x9d   :  { %383 = vrsqrt.f32 %v61_v22 }
  0xa2   :  { %v73_v27 = vpop.permute.xlu0 %72 }
  0xa3   :  { %vm74_vm1 = vcmp.eq.s32.totalorder %v73_v27, %v67_v26 }
  0xa4   :  { %370 = vmatpush3.msk.msra.mxu1 %vm74_vm1, %v439_v28  ;;  %v311_v33 = vsel %vm74_vm1, 1.0, %v436_v0 }
  0xaa   :  { %v384_v23 = vpop.eup %383 }
  0xab   :  { %v63_v24 = vmul.f32 %v384_v23, %v39_v1  ;;  %v64_v36 = vmul.f32 %v384_v23, %v384_v23 }
  0xad   :  { %367 = vmatmul.mubr.f32.vlgmr.msra.gmra.mxu0 %v63_v24  ;;  %v65_v37 = vmul.f32 %v64_v36, %v60_v21 }
 0x16d   :  { %v143_v29 = vpop.f32.mrf.mxu0 }
 0x16e   :  { %v147_v31 = vmul.f32 2.0, %v143_v29 }
 0x16f   :  { %v368_v32 = vpop.f32.mrf.mxu0 }
 0x170   :  { %v154_v34 = vsub.f32 %v312_v30, %v147_v31 }
 0x172   :  { %v155_v35 = vmul.f32 %v311_v33, %v154_v34 }
 0x174   :  { %156 = vadd.xlane.f32.xlu1 %v155_v35 }
 0x1fd   :  { %v157_v38 = vpop.xlane.xlu1 %156 }
 0x1fe   :  { %v158_v39 = vadd.f32 %v157_v38, %v65_v37 }
 0x200   :  { %v159_v40 = vmax.f32 %v158_v39, 0.0 }
 0x202   :  { %385 = vrsqrt.f32 %v159_v40  ;;  %vm162_vm2 = vcmp.eq.f32.partialorder %v159_v40, inf  ;;  %v165_v43 = vand.u32 2147483648, %v159_v40  ;;  %vm164_vm4 = vcmp.eq.f32.partialorder %v159_v40, 0.0 }
 0x20f   :  { %v386_v41 = vpop.eup %385 }
 0x210   :  { %v161_v42 = vmul.f32 %v386_v41, %v159_v40 }
 0x212   :  { %v163_v44 = vsel %vm162_vm2, %v159_v40, %v161_v42 }
 0x213   :  { %v166_v45 = vsel %vm164_vm4, %v165_v43, %v163_v44 }
 0x214   :  { %v168_v46 = vsel %vm167_vm3, %v166_v45, 1.0 }
 0x215   :  { %169 = vxpose.xlu1.b32.start.end [1/1] (short) (narrow) %v168_v46, 8 }
 0x291   :  { %v185_v47 = vpop.trf.xlu1 }
 0x292   :  { %372 = vmatmul.mubr.msk.f32.vlgmr.msra.gmra.mxu1 %vm201_vm5, %v185_v47 }
 0x352   :  { %v271_v49 = vpop.f32.mrf.mxu1 }
 0x353   :  { %v278_v50 = vadd.f32 %v277_v48, %v271_v49 }
 0x354   :  { %v373_v51 = vpop.f32.mrf.mxu1 }
 0x355   :  { %279 = vst [vmem:[#allocation2] sm:$0x3] %v278_v50 }
 0x35c   :  { %v282_v52 = vld [vmem:[#allocation2] sm:$0x3] }
 0x35d   :  { %v283_v53 = vmax.f32 %v282_v52, 1.0 }
 0x35f   :  { %v285_v54 = vrot.slane %v283_v53, 1 }
 0x361   :  { %387 = vrcp.f32 %v285_v54 }
 0x36e   :  { %v388_v55 = vpop.eup %387 }
 0x36f   :  { %v288_v56 = vmul.f32 %v388_v55, %v282_v52 }
 0x371   :  { %v290_v57 = vsel %vm289_vm6, %v288_v56, 0.0 }
 0x372   :  { %291 = vadd.xlane.f32.xlu0 %v290_v57 }
 0x3fb   :  { %v292_v58 = vpop.xlane.xlu0 %291 }
 0x3fc   :  { %295 = vst.msk [vmem:[#allocation6] sm:$0x1] %vm294_vm7, %v292_v58 }
 0x3fd   :  { %420 = shalt.err (!%p417_p9)
}
 0x3fe   :  { %305 = dma.vmem_to_hbm [thread:$0]  %s303_s25, 16, %s506_s4, [#allocation5]  }
 0x3ff   :  { %431 = dma.done.wait [#allocation5], 16  }
 0x400   :  { %432 = vsyncadd [#allocation5], 4294967280 }
 0x401   :  { %309 = vsyncpa [#allocation4], 1 }
 0x402   :  { %310 = vsyncpa [#allocation5], 1 }

</bundles_post_ra>
